<compile_context>
chip_gen: v7x
topology: tpu7x:2x2x1
jax: 0.10.0
libtpu: 0.0.40
codegen_flags: <defaults>
</compile_context>

<pallas_src>
import jax
import jax.numpy as jnp
from jax import lax
from jax.experimental import pallas as pl
from jax.experimental.pallas import tpu as pltpu


def value_network_kernel(x_ref, w1_ref, b1_ref, w2t_ref, b2_ref, o_ref):
    # x_ref:   [TB, Dp]  packed batch tile (bf16 or f32), streamed
    # w1_ref:  [Dp, Hp]  block-diagonal fc1 weights (resident)
    # b1_ref:  [1, Hp]   f32 tiled fc1 bias (resident)
    # w2t_ref: [G, Hp]   f32 block-diagonal fc2 weights, row-major (resident)
    # b2_ref:  [1, 1]    f32 scalar in SMEM
    # o_ref:   [G, TB]   lane-dense output tile; o[g, p] = value of row p*G+g

    # fc1 + ReLU: MXU matmul, native-dtype inputs, f32 accumulation.
    h = jnp.dot(x_ref[...], w1_ref[...], preferred_element_type=jnp.float32)
    h = jnp.maximum(h + b1_ref[...], 0.0)

    # fc2 as (G, Hp) . (TB, Hp)^T -> (G, TB): A.B^T form the MXU handles
    # directly (no XLU transpose of h), and the store is lane-dense.
    y = lax.dot_general(
        w2t_ref[...], h,
        dimension_numbers=(((1,), (1,)), ((), ())),
        preferred_element_type=jnp.float32,
    )
    o_ref[...] = (y + b2_ref[0, 0]).astype(o_ref.dtype)


def _pick_block_rows(dp, hp, g, x_itemsize,
                     target_tile_bytes=2 * 1024 * 1024,
                     vmem_budget=12 * 1024 * 1024):
    """Packed-row tile size: ~2 MiB of x DMA per step, VMEM-budgeted.

    VMEM accounting per packed row (the real residents, not just x):
      * 2 double-buffered x tiles      : 2 * lane_pad(Dp) * itemsize
      * f32 hidden activation h        : lane_pad(Hp) * 4
      * double-buffered output columns : 2 * G * 4
    The 12 MiB budget fits v5e's 16 MiB scoped-VMEM default with headroom
    (v6e / v7x scoped defaults are 32 MiB).
    """
    lane = 128
    dp_pad = max(lane, ((dp + lane - 1) // lane) * lane)
    hp_pad = max(lane, ((hp + lane - 1) // lane) * lane)
    per_row = 2 * dp_pad * x_itemsize + hp_pad * 4 + 2 * g * 4
    rows_target = target_tile_bytes // (dp_pad * x_itemsize)
    rows_vmem = vmem_budget // per_row
    rows = min(rows_target, rows_vmem)
    return max(128, (rows // 128) * 128)


def value_network_forward(embedding, w1, b1, w2, b2, *,
                          block_rows=None, use_bf16=True,
                          min_pallas_batch=512, force_pallas=False):
    """embedding: [B, D]; w1: [D, H]; b1: [H]; w2: [H, 1]; b2: [1] -> [B, 1]."""
    B, D = embedding.shape
    H = w1.shape[1]
    out_dtype = embedding.dtype

    # Small-batch fast path: the pallas_call dispatch + pipeline prologue
    # (µs-scale) dwarfs the arithmetic below ~512 rows.
    if not force_pallas and B < min_pallas_batch:
        h = jnp.maximum(embedding @ w1 + b1, 0.0)
        return (h @ w2 + b2).astype(out_dtype)

    # ---- feature-dim packing: make the streamed minor dim 128 lanes wide ----
    G = 128 // D if (D < 128 and 128 % D == 0) else 1
    Dp, Hp = G * D, G * H

    b_pad = ((B + G - 1) // G) * G
    x = embedding
    if b_pad != B:
        x = jnp.pad(x, ((0, b_pad - B), (0, 0)))
    bp = b_pad // G
    x = x.reshape(bp, Dp)            # row-major: packed row p = rows p*G..p*G+G-1

    compute_dtype = jnp.bfloat16 if use_bf16 else x.dtype
    x = x.astype(compute_dtype)      # halve streamed HBM bytes (bf16 path)

    # Block-diagonal weights so the packed layout needs no in-kernel unpack.
    eye = jnp.eye(G, dtype=jnp.float32)
    w1_stack = jnp.kron(eye, w1.astype(jnp.float32)).astype(compute_dtype)   # (Dp, Hp)
    b1_stack = jnp.tile(b1.astype(jnp.float32), G).reshape(1, Hp)             # (1, Hp)
    w2t_stack = jnp.kron(eye, w2.reshape(1, H).astype(jnp.float32))           # (G, Hp)
    b2_sc = b2.reshape(1, 1).astype(jnp.float32)                              # SMEM scalar

    # ---- tile selection (bytes-based, VMEM-budgeted) ----
    if block_rows is None:
        block_rows = _pick_block_rows(Dp, Hp, G, jnp.dtype(compute_dtype).itemsize)
    # v7x megacore: keep >= 2 grid steps for non-trivial batches so the
    # "parallel" grid axis can shard across both TensorCores.
    if bp >= 256:
        half = max(128, (pl.cdiv(bp, 2) // 128) * 128)
        block_rows = min(block_rows, half)
    if block_rows >= bp:
        block_rows = bp                                   # single full block
    else:
        block_rows = max(128, (block_rows // 128) * 128)  # keep tiles 128-aligned

    num_blocks = pl.cdiv(bp, block_rows)
    padded_bp = num_blocks * block_rows

    out = pl.pallas_call(
        value_network_kernel,
        out_shape=jax.ShapeDtypeStruct((G, padded_bp), jnp.float32),
        grid_spec=pltpu.PrefetchScalarGridSpec(
            num_scalar_prefetch=0,
            grid=(num_blocks,),
            in_specs=[
                # x tile streamed over the packed batch (default double buffer:
                # the exposed cost here is per-step overhead, not DMA latency).
                pl.BlockSpec((block_rows, Dp), lambda i: (i, 0)),
                pl.BlockSpec((Dp, Hp), lambda i: (0, 0)),    # W1 (resident)
                pl.BlockSpec((1, Hp), lambda i: (0, 0)),     # b1 (resident)
                pl.BlockSpec((G, Hp), lambda i: (0, 0)),     # W2^T (resident)
                pl.BlockSpec(memory_space=pltpu.MemorySpace.SMEM),  # b2 scalar
            ],
            # Lane-dense output: each step writes a 128*k-wide lane range of a
            # (G, padded_Bp) slab with full unmasked vector stores.
            out_specs=pl.BlockSpec((G, block_rows), lambda i: (0, i)),
        ),
        compiler_params=pltpu.CompilerParams(
            dimension_semantics=("parallel",),
        ),
    )(x, w1_stack, b1_stack, w2t_stack, b2_sc)

    # out[g, p] = value of logical row p*G + g.  Transpose (tiny), flatten in
    # logical order, then drop both pad rows and ragged-tile garbage BEFORE the
    # result can be reduced or escape.
    return out.T.reshape(-1)[:B].reshape(B, 1).astype(out_dtype)


def init_value_network_params(key, latent_size, num_sample_trajectories, hidden_size):
    """Deterministic init matching nn.Linear's U(-1/sqrt(fan_in), 1/sqrt(fan_in))."""
    in_dim = latent_size + num_sample_trajectories
    k1, k2, k3, k4 = jax.random.split(key, 4)
    bound1 = 1.0 / jnp.sqrt(in_dim)
    bound2 = 1.0 / jnp.sqrt(hidden_size)
    # Stored transposed relative to PyTorch: [in, out]
    w1 = jax.random.uniform(k1, (in_dim, hidden_size), jnp.float32, -bound1, bound1)
    b1 = jax.random.uniform(k2, (hidden_size,), jnp.float32, -bound1, bound1)
    w2 = jax.random.uniform(k3, (hidden_size, 1), jnp.float32, -bound2, bound2)
    b2 = jax.random.uniform(k4, (1,), jnp.float32, -bound2, bound2)
    return w1, b1, w2, b2


if __name__ == "__main__":
    # Module hyperparameters (small, consistent with the forward pass)
    latent_size = 24
    num_sample_trajectories = 8
    hidden_size = 32
    D = latent_size + num_sample_trajectories   # 32 -> packing factor G = 4

    key = jax.random.PRNGKey(0)
    k_params, k_x1, k_x2 = jax.random.split(key, 3)
    w1, b1, w2, b2 = init_value_network_params(
        k_params, latent_size, num_sample_trajectories, hidden_size
    )

    def reference(x, cast_bf16=False):
        xr, w1r = x, w1
        if cast_bf16:
            xr = xr.astype(jnp.bfloat16).astype(jnp.float32)
            w1r = w1r.astype(jnp.bfloat16).astype(jnp.float32)
        h = jnp.maximum(jnp.dot(xr, w1r, precision=lax.Precision.HIGHEST) + b1, 0.0)
        return jnp.dot(h, w2, precision=lax.Precision.HIGHEST) + b2

    # 1) Tiny batch (typical call shape): plain-jnp fast path.
    x1 = jax.random.normal(k_x1, (8, D), dtype=jnp.float32)
    o1 = jax.block_until_ready(value_network_forward(x1, w1, b1, w2, b2))
    assert o1.shape == (8, 1)
    assert jnp.allclose(o1, reference(x1), atol=2e-2, rtol=2e-2), "mismatch (fast path)"

    # 2) Tiny batch forced through the Pallas kernel in f32 (single packed block).
    o2 = jax.block_until_ready(
        value_network_forward(x1, w1, b1, w2, b2, use_bf16=False, force_pallas=True)
    )
    assert o2.shape == (8, 1)
    assert jnp.allclose(o2, reference(x1), atol=2e-2, rtol=2e-2), "mismatch (f32 kernel)"

    # 3) Larger batch: exercises packing with a pad row (2050 % 4 != 0), the
    #    multi-step parallel grid, resident weights, the ragged final tile and
    #    the bf16 streaming path.
    B3 = 2050
    x3 = jax.random.normal(k_x2, (B3, D), dtype=jnp.float32)
    o3 = jax.block_until_ready(value_network_forward(x3, w1, b1, w2, b2))
    assert o3.shape == (B3, 1)
    assert jnp.allclose(o3, reference(x3, cast_bf16=True), atol=2e-2, rtol=2e-2), \
        "mismatch (bf16 multi-block)"

    print("KERNEL_OK")
</pallas_src>

<mosaic_0001>
module attributes {stable_mosaic.version = 11 : i64} {
  func.func @value_network_kernel(%arg0: i32, %arg1: memref<2x128xf32, #tpu.memory_space<vmem>>, %arg2: memref<128x128xf32, #tpu.memory_space<vmem>>, %arg3: memref<1x128xf32, #tpu.memory_space<vmem>>, %arg4: memref<4x128xf32, #tpu.memory_space<vmem>>, %arg5: memref<1x1xf32, #tpu.memory_space<smem>>, %arg6: memref<4x2xf32, #tpu.memory_space<vmem>>) attributes {dimension_semantics = [#tpu.dimension_semantics<parallel>], iteration_bounds = array<i64: 1>, scalar_prefetch = 0 : i64, scratch_operands = 0 : i64, tpu.core_type = #tpu.core_type<tc>, window_params = [{transform_indices = @transform_0, window_bounds = array<i64: 2, 128>}, {pipeline_mode = #tpu.pipeline_mode<synchronous>, transform_indices = @transform_1, window_bounds = array<i64: 128, 128>}, {pipeline_mode = #tpu.pipeline_mode<synchronous>, transform_indices = @transform_2, window_bounds = array<i64: 1, 128>}, {pipeline_mode = #tpu.pipeline_mode<synchronous>, transform_indices = @transform_3, window_bounds = array<i64: 4, 128>}, {transform_indices = @transform_4, window_bounds = array<i64: 1, 1>}, {transform_indices = @transform_5, window_bounds = array<i64: 4, 2>}]} {
    %c0 = arith.constant 0 : index
    %c0_0 = arith.constant 0 : index
    %0 = vector.load %arg1[%c0, %c0_0] : memref<2x128xf32, #tpu.memory_space<vmem>>, vector<2x128xf32>
    %c0_1 = arith.constant 0 : index
    %c0_2 = arith.constant 0 : index
    %1 = vector.load %arg2[%c0_1, %c0_2] : memref<128x128xf32, #tpu.memory_space<vmem>>, vector<128x128xf32>
    %cst = arith.constant dense<0.000000e+00> : vector<2x128xf32>
    %2 = tpu.matmul %0, %1, %cst {dimension_numbers = #tpu.dot_dimension_numbers<[1], [0], [0], [1], [0, 0, 1, 1], [], []>} : vector<2x128xf32>, vector<128x128xf32>, vector<2x128xf32> -> vector<2x128xf32>
    %c0_3 = arith.constant 0 : index
    %c0_4 = arith.constant 0 : index
    %3 = vector.load %arg3[%c0_3, %c0_4] : memref<1x128xf32, #tpu.memory_space<vmem>>, vector<1x128xf32>
    %4 = vector.broadcast %3 : vector<1x128xf32> to vector<2x128xf32>
    %5 = arith.addf %2, %4 : vector<2x128xf32>
    %cst_5 = arith.constant 0.000000e+00 : f32
    %6 = vector.broadcast %cst_5 : f32 to vector<2x128xf32>
    %7 = arith.maximumf %5, %6 : vector<2x128xf32>
    %c0_6 = arith.constant 0 : index
    %c0_7 = arith.constant 0 : index
    %8 = vector.load %arg4[%c0_6, %c0_7] : memref<4x128xf32, #tpu.memory_space<vmem>>, vector<4x128xf32>
    %cst_8 = arith.constant dense<0.000000e+00> : vector<4x2xf32>
    %9 = tpu.matmul %8, %7, %cst_8 {dimension_numbers = #tpu.dot_dimension_numbers<[1], [1], [0], [0], [0, 0, 1, 0], [], []>} : vector<4x128xf32>, vector<2x128xf32>, vector<4x2xf32> -> vector<4x2xf32>
    %c0_9 = arith.constant 0 : index
    %c0_10 = arith.constant 0 : index
    %10 = memref.load %arg5[%c0_9, %c0_10] : memref<1x1xf32, #tpu.memory_space<smem>>
    %11 = vector.broadcast %10 : f32 to vector<4x2xf32>
    %12 = arith.addf %9, %11 : vector<4x2xf32>
    %c0_11 = arith.constant 0 : index
    %c0_12 = arith.constant 0 : index
    %13 = vector.load %arg6[%c0_11, %c0_12] : memref<4x2xf32, #tpu.memory_space<vmem>>, vector<4x2xf32>
    tpu.vector_store %arg6[%c0_11, %c0_12], %12 {strides = array<i32>} : memref<4x2xf32, #tpu.memory_space<vmem>>, vector<4x2xf32>,
    return
  }
  func.func @transform_0(%arg0: i32) -> (i32, i32) {
    %c0_i32 = arith.constant 0 : i32
    %c0_i32_0 = arith.constant 0 : i32
    return %arg0, %c0_i32 : i32, i32
  }
  func.func @transform_1(%arg0: i32) -> (i32, i32) {
    %c0_i32 = arith.constant 0 : i32
    %c0_i32_0 = arith.constant 0 : i32
    %c0_i32_1 = arith.constant 0 : i32
    return %c0_i32, %c0_i32_0 : i32, i32
  }
  func.func @transform_2(%arg0: i32) -> (i32, i32) {
    %c0_i32 = arith.constant 0 : i32
    %c0_i32_0 = arith.constant 0 : i32
    %c0_i32_1 = arith.constant 0 : i32
    return %c0_i32, %c0_i32_0 : i32, i32
  }
  func.func @transform_3(%arg0: i32) -> (i32, i32) {
    %c0_i32 = arith.constant 0 : i32
    %c0_i32_0 = arith.constant 0 : i32
    %c0_i32_1 = arith.constant 0 : i32
    return %c0_i32, %c0_i32_0 : i32, i32
  }
  func.func @transform_4(%arg0: i32) -> (i32, i32) {
    %c0_i32 = arith.constant 0 : i32
    %c0_i32_0 = arith.constant 0 : i32
    %c0_i32_1 = arith.constant 0 : i32
    return %c0_i32, %c0_i32_0 : i32, i32
  }
  func.func @transform_5(%arg0: i32) -> (i32, i32) {
    %c0_i32 = arith.constant 0 : i32
    %c0_i32_0 = arith.constant 0 : i32
    return %c0_i32, %arg0 : i32, i32
  }
}

</mosaic_0001>

<bundles_post_ra>
// kernel: tpu_custom_call.1
= control target key start
LH: loop header
LB: loop body
LE: loop exit
PB: predicated region body
PF: predicated region fallthrough
CT: control target
= control target key end

     0   :  { %11 = vsyncpa [#allocation4], 0  ;;  %s324_s18 = smov [#allocation3]   ;;  %s387_s0 = inlined_call_operand.vmem [shape: f32[2,128], index: 0, kind: input, shape index: {}]   ;;  %s388_s1 = inlined_call_operand.hbm [shape: f32[128,128], index: 1, kind: input, shape index: {}]   ;;  %s389_s2 = inlined_call_operand.vmem [shape: f32[1,128], index: 2, kind: input, shape index: {}]   ;;  %s390_s3 = inlined_call_operand.vmem [shape: f32[4,128], index: 3, kind: input, shape index: {}]   ;;  %s391_s4 = inlined_call_operand.<no memory space> [shape: f32[1,1], index: 4, kind: input, shape index: {}]   ;;  %s392_s5 = inlined_call_operand.vmem [shape: f32[4,2], index: 5, kind: output, shape index: {}]  }
   0x1   :  { %s19_s19 = sshll.u32 %s324_s18, 4  ;;  %s300_s22 = scalar_lea.hbm %s388_s1, 2048  ;;  %s20_s19 = int_to_ptr.vmem [resolvable:$true] %s19_s19 }
   0x2   :  { %p301_p0 = scmp.ne.s32.totalorder %s388_s1, %s300_s22  ;;  %p304_p1 = scmp.lt.u32.totalorder %s300_s22, %s388_s1 }
   0x4   :  { %p306_p2 = pnand %p304_p1, %p301_p0 }
   0x6   :  { %309 = shalt.err (!%p306_p2)
}
   0x7   :  { %s310_s27 = scalar_lea.vmem %s20_s19, 2048  ;;  %p315_p4 = scmp.lt.s32.totalorder %s20_s19, %s20_s19 }
   0x8   :  { %p311_p3 = scmp.ne.s32.totalorder %s20_s19, %s310_s27  ;;  %p316_p5 = scmp.lt.s32.totalorder %s310_s27, %s310_s27 }
   0xa   :  { %p317_p6 = por %p316_p5, %p315_p4 }
   0xc   :  { %p318_p7 = pnand %p317_p6, %p311_p3 }
   0xe   :  { %321 = shalt.err (!%p318_p7)
}
   0xf   :  { %s325_s28 = smov 128   ;;  %s326_s29 = smov 8  }
  0x10   :  { %25 = dma.hbm_to_vmem [thread:$0]  %s388_s1, 2048, %s20_s19, [#allocation4], %s325_s28, %s325_s28, %s326_s29  }
  0x11   :  { %322 = dma.done.wait [#allocation4], 2048  }
  0x12   :  { %323 = vsyncadd [#allocation4], 4294965248  ;;  %v327_v0 = vmov 0.0|0.0   ;;  %vm328_vm0 = vmmov 0   ;;  %v329_v1 = vmov 0.0   ;;  %v36_v2 = vld [vmem:[#allocation3] sm:$0xff]  ;;  %v132_v33 = vstv %s391_s4 }
  0x13   :  { %270 = vmatprep.subr.bf16.mxu0 %v327_v0  ;;  %262 = vmatprep.mubr.msk.f32.mxu0 %vm328_vm0, %v329_v1  ;;  %v37_v3 = vld [vmem:[#allocation3 + $0x8] sm:$0xff]  ;;  %v38_v4 = vld [vmem:[#allocation3 + $0x10] sm:$0xff]  ;;  %v39_v6 = vld [vmem:[#allocation3 + $0x18] sm:$0xff]  ;;  %vm203_vm1 = vcmask 11264  }
  0x14   :  { %265 = vmatprep.subr.mxu1 %v329_v1  ;;  %267 = vmatprep.mubr.msk.f32.mxu1 %vm328_vm0, %v329_v1  ;;  %v271_v5 = vpack.c.bf16 %v37_v3, %v36_v2  ;;  %v274_v7 = vpack.c.bf16 %v39_v6, %v38_v4  ;;  %v40_v8 = vld [vmem:[#allocation3 + $0x20] sm:$0xff]  ;;  %v41_v9 = vld [vmem:[#allocation3 + $0x28] sm:$0xff]  ;;  %v42_v11 = vld [vmem:[#allocation3 + $0x30] sm:$0xff] }
  0x15   :  { %v277_v10 = vpack.c.bf16 %v41_v9, %v40_v8  ;;  %v43_v12 = vld [vmem:[#allocation3 + $0x38] sm:$0xff]  ;;  %v44_v14 = vld [vmem:[#allocation3 + $0x40] sm:$0xff]  ;;  %v45_v15 = vld [vmem:[#allocation3 + $0x48] sm:$0xff] }
  0x16   :  { %272 = vmatpush3.bf16.msra.mxu0 %v271_v5  ;;  %v280_v13 = vpack.c.bf16 %v43_v12, %v42_v11  ;;  %v283_v16 = vpack.c.bf16 %v45_v15, %v44_v14  ;;  %v46_v17 = vld [vmem:[#allocation3 + $0x50] sm:$0xff]  ;;  %v47_v18 = vld [vmem:[#allocation3 + $0x58] sm:$0xff]  ;;  %v48_v20 = vld [vmem:[#allocation3 + $0x60] sm:$0xff] }
  0x17   :  { %273 = vmatprep.subr.bf16.mxu0 %v327_v0  ;;  %v286_v19 = vpack.c.bf16 %v47_v18, %v46_v17  ;;  %v49_v21 = vld [vmem:[#allocation3 + $0x68] sm:$0xff]  ;;  %v50_v23 = vld [vmem:[#allocation3 + $0x70] sm:$0xff]  ;;  %v51_v24 = vld [vmem:[#allocation3 + $0x78] sm:$0xff] }
  0x18   :  { %v289_v22 = vpack.c.bf16 %v49_v21, %v48_v20  ;;  %v292_v25 = vpack.c.bf16 %v51_v24, %v50_v23  ;;  %v35_v26 = vld [vmem:[%s387_s0] sm:$0x3] }
  0x19   :  { %v210_v27 = vld [vmem:[%s389_s2] ss:$0 sm:$0xff] }
  0x1a   :  { %275 = vmatpush3.bf16.msra.mxu0 %v274_v7  ;;  %v130_v32 = vld [vmem:[%s390_s3] sm:$0xf] }
  0x1b   :  { %276 = vmatprep.subr.bf16.mxu0 %v327_v0 }
  0x1e   :  { %278 = vmatpush3.bf16.msra.mxu0 %v277_v10 }
  0x1f   :  { %279 = vmatprep.subr.bf16.mxu0 %v327_v0 }
  0x22   :  { %281 = vmatpush3.bf16.msra.mxu0 %v280_v13 }
  0x23   :  { %282 = vmatprep.subr.bf16.mxu0 %v327_v0 }
  0x26   :  { %284 = vmatpush3.bf16.msra.mxu0 %v283_v16 }
  0x27   :  { %285 = vmatprep.subr.bf16.mxu0 %v327_v0 }
  0x2a   :  { %287 = vmatpush3.bf16.msra.mxu0 %v286_v19 }
  0x2b   :  { %288 = vmatprep.subr.bf16.mxu0 %v327_v0 }
  0x2e   :  { %290 = vmatpush3.bf16.msra.mxu0 %v289_v22 }
  0x2f   :  { %291 = vmatprep.subr.bf16.mxu0 %v327_v0 }
  0x32   :  { %293 = vmatpush3.bf16.msra.mxu0 %v292_v25 }
  0x35   :  { %263 = vmatmul.mubr.f32.vlgmr.msra.gmra.mrb[0].mxu0 %v35_v26 }
 0x108   :  { %v125_v28 = vpop.f32.mrb[0].mxu0 }
 0x109   :  { %v126_v29 = vadd.f32 %v210_v27, %v125_v28  ;;  %v264_v30 = vpop.f32.mrb[1].mxu0 }
 0x10b   :  { %v129_v31 = vmax.f32 %v126_v29, 0.0 }
 0x10d   :  { %266 = vmatpush3.xpose.msra.mxu1 %v129_v31 }
 0x110   :  { %268 = vmatmul.mubr.f32.vlgmr.msra.gmra.mrb[0].mxu1 %v130_v32 }
 0x1e3   :  { %v199_v34 = vpop.f32.mrb[0].mxu1 }
 0x1e4   :  { %v200_v35 = vadd.f32 %v199_v34, %v132_v33  ;;  %v269_v36 = vpop.f32.mrb[1].mxu1 }
 0x1e6   :  { %204 = vst.msk [vmem:[%s392_s5] sm:$0xf] %vm203_vm1, %v200_v35 }
 0x1e7   :  { %209 = vsyncpa [#allocation4], 1 }

</bundles_post_ra>
